<compile_context>
chip_gen: v7x
topology: tpu7x:2x2x1
jax: 0.10.0
libtpu: 0.0.40
codegen_flags: <defaults>
</compile_context>

<pallas_src>
import jax
import jax.numpy as jnp
from jax.experimental import pallas as pl
from jax.experimental.pallas import tpu as pltpu

LANE = 128
SUBLANE = 8


def _round_up(n, m):
    return ((n + m - 1) // m) * m


def bayesian_logistic_kernel(x_ref, w_ref, b_ref, out_ref):
    """One batch tile of the 3-layer Bayesian MLP.

    x_ref  : (TB, 128)          f32, zero-padded activations
    w_ref  : (3, 3, 128, 128)   f32, [layer, {mu, sigma, eps}, in_pad, out_pad]
    b_ref  : (3, 3, 1, 128)     f32, [layer, {mu, sigma, eps}, 1, out_pad]
    out_ref: (TB, 128)          f32, zero-padded output
    """
    h = x_ref[...]  # already f32
    for layer in range(3):  # static unroll, 3 tiny layers
        # Reparameterization sampling in f32 (VPU); padded rows/cols are 0.
        w = w_ref[layer, 0] + w_ref[layer, 1] * w_ref[layer, 2]   # (128, 128)
        b = b_ref[layer, 0] + b_ref[layer, 1] * b_ref[layer, 2]   # (1, 128)
        # bf16 operands into the MXU, f32 accumulation.
        h = jnp.dot(h.astype(jnp.bfloat16), w.astype(jnp.bfloat16),
                    preferred_element_type=jnp.float32)
        h += b
    out_ref[...] = h


def pack_params(layers):
    """Pack per-layer (w_mu, w_rho, w_eps, b_mu, b_rho, b_eps) into two
    lane-dense slabs. sigma = softplus(rho) is precomputed here (stable)."""
    w_comps, b_comps = [], []
    for (w_mu, w_rho, w_eps, b_mu, b_rho, b_eps) in layers:
        d_in, d_out = w_mu.shape
        assert d_in <= LANE and d_out <= LANE, "layer dims must fit one 128 tile"
        w_sigma = jax.nn.softplus(w_rho)
        b_sigma = jax.nn.softplus(b_rho)

        def pad_w(a):
            return jnp.zeros((LANE, LANE), jnp.float32).at[:d_in, :d_out].set(a)

        def pad_b(a):
            return jnp.zeros((1, LANE), jnp.float32).at[0, :d_out].set(a)

        w_comps.append(jnp.stack([pad_w(w_mu), pad_w(w_sigma), pad_w(w_eps)]))
        b_comps.append(jnp.stack([pad_b(b_mu), pad_b(b_sigma), pad_b(b_eps)]))
    return jnp.stack(w_comps), jnp.stack(b_comps)  # (3,3,128,128), (3,3,1,128)


def bayesian_logistic_forward(x, w_slab, b_slab, output_dim, *, tile_batch=128):
    """x: (B, input_dim) f32. Returns (B, output_dim) f32."""
    batch, in_dim = x.shape
    batch_pad = _round_up(batch, SUBLANE)
    tb = min(batch_pad, _round_up(tile_batch, SUBLANE))
    batch_pad = _round_up(batch_pad, tb)

    x_pad = jnp.zeros((batch_pad, LANE), jnp.float32).at[:batch, :in_dim].set(x)

    out = pl.pallas_call(
        bayesian_logistic_kernel,
        out_shape=jax.ShapeDtypeStruct((batch_pad, LANE), jnp.float32),
        grid=(batch_pad // tb,),
        in_specs=[
            pl.BlockSpec((tb, LANE), lambda i: (i, 0)),            # streamed x
            pl.BlockSpec((3, 3, LANE, LANE), lambda i: (0, 0, 0, 0)),  # resident W
            pl.BlockSpec((3, 3, 1, LANE), lambda i: (0, 0, 0, 0)),     # resident b
        ],
        out_specs=pl.BlockSpec((tb, LANE), lambda i: (i, 0)),      # lane-dense out
        compiler_params=pltpu.CompilerParams(
            dimension_semantics=("parallel",)),
    )(x_pad, w_slab, b_slab)

    return out[:batch, :output_dim]


def init_params(key, input_dim, output_dim):
    """Synthetic BayesianLinear parameters (mu, rho, eps) per layer."""
    dims = [(input_dim, 100), (100, 20), (20, output_dim)]
    layers = []
    for d_in, d_out in dims:
        key, k_wmu, k_weps, k_bmu, k_beps = jax.random.split(key, 5)
        w_mu = 0.1 * jax.random.normal(k_wmu, (d_in, d_out), jnp.float32)
        w_rho = jnp.full((d_in, d_out), -5.0, jnp.float32)
        w_eps = jax.random.normal(k_weps, (d_in, d_out), jnp.float32)
        b_mu = 0.1 * jax.random.normal(k_bmu, (d_out,), jnp.float32)
        b_rho = jnp.full((d_out,), -5.0, jnp.float32)
        b_eps = jax.random.normal(k_beps, (d_out,), jnp.float32)
        layers.append((w_mu, w_rho, w_eps, b_mu, b_rho, b_eps))
    return layers


def reference_forward_bf16(x, layers):
    """Pure-JAX reference with the same bf16 MXU operand casts as the kernel."""
    h = x
    for (w_mu, w_rho, w_eps, b_mu, b_rho, b_eps) in layers:
        w = w_mu + jax.nn.softplus(w_rho) * w_eps
        b = b_mu + jax.nn.softplus(b_rho) * b_eps
        h = jnp.dot(h.astype(jnp.bfloat16), w.astype(jnp.bfloat16),
                    preferred_element_type=jnp.float32) + b
    return h


def reference_forward_f32(x, layers):
    """Pure-f32 reference (original module semantics)."""
    h = x
    for (w_mu, w_rho, w_eps, b_mu, b_rho, b_eps) in layers:
        w = w_mu + jax.nn.softplus(w_rho) * w_eps
        b = b_mu + jax.nn.softplus(b_rho) * b_eps
        h = h @ w + b
    return h


if __name__ == "__main__":
    key = jax.random.PRNGKey(0)
    key, k_x = jax.random.split(key)

    batch, input_dim, output_dim = 8, 5, 2
    # x2 = sign(x) * x^2, as in the reference script's data generation
    x_raw = jax.random.normal(k_x, (batch, input_dim), jnp.float32)
    x = jnp.square(x_raw) * jnp.sign(x_raw)

    layers = init_params(key, input_dim, output_dim)
    w_slab, b_slab = pack_params(layers)

    out = bayesian_logistic_forward(x, w_slab, b_slab, output_dim)
    out = jax.block_until_ready(out)
    assert out.shape == (batch, output_dim)

    # Tight check against a reference doing the same bf16 MXU casts.
    ref_bf16 = reference_forward_bf16(x, layers)
    assert jnp.allclose(out, ref_bf16, atol=2e-3, rtol=2e-3)

    # Loose check against the full-f32 module semantics.
    ref_f32 = reference_forward_f32(x, layers)
    assert jnp.allclose(out, ref_f32, atol=5e-2, rtol=5e-2)

    # Larger batch exercising the multi-step parallel grid (n1=200 in the spec).
    key, k_big = jax.random.split(key)
    xb_raw = jax.random.normal(k_big, (200, input_dim), jnp.float32)
    xb = jnp.square(xb_raw) * jnp.sign(xb_raw)
    out_big = jax.block_until_ready(
        bayesian_logistic_forward(xb, w_slab, b_slab, output_dim))
    assert out_big.shape == (200, output_dim)
    assert jnp.allclose(out_big, reference_forward_bf16(xb, layers),
                        atol=2e-3, rtol=2e-3)

    print("KERNEL_OK")
</pallas_src>

<mosaic_0001>
module attributes {stable_mosaic.version = 11 : i64} {
  func.func @bayesian_logistic_kernel(%arg0: i32, %arg1: memref<8x128xf32, #tpu.memory_space<vmem>>, %arg2: memref<3x3x128x128xf32, #tpu.memory_space<vmem>>, %arg3: memref<3x3x1x128xf32, #tpu.memory_space<vmem>>, %arg4: memref<8x128xf32, #tpu.memory_space<vmem>>) attributes {dimension_semantics = [#tpu.dimension_semantics<parallel>], iteration_bounds = array<i64: 1>, scalar_prefetch = 0 : i64, scratch_operands = 0 : i64, tpu.core_type = #tpu.core_type<tc>, window_params = [{transform_indices = @transform_0, window_bounds = array<i64: 8, 128>}, {pipeline_mode = #tpu.pipeline_mode<synchronous>, transform_indices = @transform_1, window_bounds = array<i64: 3, 3, 128, 128>}, {pipeline_mode = #tpu.pipeline_mode<synchronous>, transform_indices = @transform_2, window_bounds = array<i64: 3, 3, 1, 128>}, {transform_indices = @transform_3, window_bounds = array<i64: 8, 128>}]} {
    %c0 = arith.constant 0 : index
    %c0_0 = arith.constant 0 : index
    %0 = vector.load %arg1[%c0, %c0_0] : memref<8x128xf32, #tpu.memory_space<vmem>>, vector<8x128xf32>
    %c0_1 = arith.constant 0 : index
    %c0_2 = arith.constant 0 : index
    %c0_3 = arith.constant 0 : index
    %c0_4 = arith.constant 0 : index
    %1 = vector.load %arg2[%c0_1, %c0_2, %c0_3, %c0_4] : memref<3x3x128x128xf32, #tpu.memory_space<vmem>>, vector<1x1x128x128xf32>
    %2 = vector.shape_cast %1 : vector<1x1x128x128xf32> to vector<128x128xf32>
    %c0_5 = arith.constant 0 : index
    %c1 = arith.constant 1 : index
    %c0_6 = arith.constant 0 : index
    %c0_7 = arith.constant 0 : index
    %3 = vector.load %arg2[%c0_5, %c1, %c0_6, %c0_7] : memref<3x3x128x128xf32, #tpu.memory_space<vmem>>, vector<1x1x128x128xf32>
    %4 = vector.shape_cast %3 : vector<1x1x128x128xf32> to vector<128x128xf32>
    %c0_8 = arith.constant 0 : index
    %c2 = arith.constant 2 : index
    %c0_9 = arith.constant 0 : index
    %c0_10 = arith.constant 0 : index
    %5 = vector.load %arg2[%c0_8, %c2, %c0_9, %c0_10] : memref<3x3x128x128xf32, #tpu.memory_space<vmem>>, vector<1x1x128x128xf32>
    %6 = vector.shape_cast %5 : vector<1x1x128x128xf32> to vector<128x128xf32>
    %7 = arith.mulf %4, %6 : vector<128x128xf32>
    %8 = arith.addf %2, %7 : vector<128x128xf32>
    %c0_11 = arith.constant 0 : index
    %c0_12 = arith.constant 0 : index
    %c0_13 = arith.constant 0 : index
    %c0_14 = arith.constant 0 : index
    %9 = vector.load %arg3[%c0_11, %c0_12, %c0_13, %c0_14] : memref<3x3x1x128xf32, #tpu.memory_space<vmem>>, vector<1x1x1x128xf32>
    %10 = vector.shape_cast %9 : vector<1x1x1x128xf32> to vector<1x128xf32>
    %c0_15 = arith.constant 0 : index
    %c1_16 = arith.constant 1 : index
    %c0_17 = arith.constant 0 : index
    %c0_18 = arith.constant 0 : index
    %11 = vector.load %arg3[%c0_15, %c1_16, %c0_17, %c0_18] : memref<3x3x1x128xf32, #tpu.memory_space<vmem>>, vector<1x1x1x128xf32>
    %12 = vector.shape_cast %11 : vector<1x1x1x128xf32> to vector<1x128xf32>
    %c0_19 = arith.constant 0 : index
    %c2_20 = arith.constant 2 : index
    %c0_21 = arith.constant 0 : index
    %c0_22 = arith.constant 0 : index
    %13 = vector.load %arg3[%c0_19, %c2_20, %c0_21, %c0_22] : memref<3x3x1x128xf32, #tpu.memory_space<vmem>>, vector<1x1x1x128xf32>
    %14 = vector.shape_cast %13 : vector<1x1x1x128xf32> to vector<1x128xf32>
    %15 = arith.mulf %12, %14 : vector<1x128xf32>
    %16 = arith.addf %10, %15 : vector<1x128xf32>
    %17 = arith.truncf %0 : vector<8x128xf32> to vector<8x128xbf16>
    %18 = arith.truncf %8 : vector<128x128xf32> to vector<128x128xbf16>
    %cst = arith.constant dense<0.000000e+00> : vector<8x128xf32>
    %19 = tpu.matmul %17, %18, %cst {dimension_numbers = #tpu.dot_dimension_numbers<[1], [0], [0], [1], [0, 0, 1, 1], [], []>} : vector<8x128xbf16>, vector<128x128xbf16>, vector<8x128xf32> -> vector<8x128xf32>
    %20 = vector.broadcast %16 : vector<1x128xf32> to vector<8x128xf32>
    %21 = arith.addf %19, %20 : vector<8x128xf32>
    %c1_23 = arith.constant 1 : index
    %c0_24 = arith.constant 0 : index
    %c0_25 = arith.constant 0 : index
    %c0_26 = arith.constant 0 : index
    %22 = vector.load %arg2[%c1_23, %c0_24, %c0_25, %c0_26] : memref<3x3x128x128xf32, #tpu.memory_space<vmem>>, vector<1x1x128x128xf32>
    %23 = vector.shape_cast %22 : vector<1x1x128x128xf32> to vector<128x128xf32>
    %c1_27 = arith.constant 1 : index
    %c1_28 = arith.constant 1 : index
    %c0_29 = arith.constant 0 : index
    %c0_30 = arith.constant 0 : index
    %24 = vector.load %arg2[%c1_27, %c1_28, %c0_29, %c0_30] : memref<3x3x128x128xf32, #tpu.memory_space<vmem>>, vector<1x1x128x128xf32>
    %25 = vector.shape_cast %24 : vector<1x1x128x128xf32> to vector<128x128xf32>
    %c1_31 = arith.constant 1 : index
    %c2_32 = arith.constant 2 : index
    %c0_33 = arith.constant 0 : index
    %c0_34 = arith.constant 0 : index
    %26 = vector.load %arg2[%c1_31, %c2_32, %c0_33, %c0_34] : memref<3x3x128x128xf32, #tpu.memory_space<vmem>>, vector<1x1x128x128xf32>
    %27 = vector.shape_cast %26 : vector<1x1x128x128xf32> to vector<128x128xf32>
    %28 = arith.mulf %25, %27 : vector<128x128xf32>
    %29 = arith.addf %23, %28 : vector<128x128xf32>
    %c1_35 = arith.constant 1 : index
    %c0_36 = arith.constant 0 : index
    %c0_37 = arith.constant 0 : index
    %c0_38 = arith.constant 0 : index
    %30 = vector.load %arg3[%c1_35, %c0_36, %c0_37, %c0_38] : memref<3x3x1x128xf32, #tpu.memory_space<vmem>>, vector<1x1x1x128xf32>
    %31 = vector.shape_cast %30 : vector<1x1x1x128xf32> to vector<1x128xf32>
    %c1_39 = arith.constant 1 : index
    %c1_40 = arith.constant 1 : index
    %c0_41 = arith.constant 0 : index
    %c0_42 = arith.constant 0 : index
    %32 = vector.load %arg3[%c1_39, %c1_40, %c0_41, %c0_42] : memref<3x3x1x128xf32, #tpu.memory_space<vmem>>, vector<1x1x1x128xf32>
    %33 = vector.shape_cast %32 : vector<1x1x1x128xf32> to vector<1x128xf32>
    %c1_43 = arith.constant 1 : index
    %c2_44 = arith.constant 2 : index
    %c0_45 = arith.constant 0 : index
    %c0_46 = arith.constant 0 : index
    %34 = vector.load %arg3[%c1_43, %c2_44, %c0_45, %c0_46] : memref<3x3x1x128xf32, #tpu.memory_space<vmem>>, vector<1x1x1x128xf32>
    %35 = vector.shape_cast %34 : vector<1x1x1x128xf32> to vector<1x128xf32>
    %36 = arith.mulf %33, %35 : vector<1x128xf32>
    %37 = arith.addf %31, %36 : vector<1x128xf32>
    %38 = arith.truncf %21 : vector<8x128xf32> to vector<8x128xbf16>
    %39 = arith.truncf %29 : vector<128x128xf32> to vector<128x128xbf16>
    %cst_47 = arith.constant dense<0.000000e+00> : vector<8x128xf32>
    %40 = tpu.matmul %38, %39, %cst_47 {dimension_numbers = #tpu.dot_dimension_numbers<[1], [0], [0], [1], [0, 0, 1, 1], [], []>} : vector<8x128xbf16>, vector<128x128xbf16>, vector<8x128xf32> -> vector<8x128xf32>
    %41 = vector.broadcast %37 : vector<1x128xf32> to vector<8x128xf32>
    %42 = arith.addf %40, %41 : vector<8x128xf32>
    %c2_48 = arith.constant 2 : index
    %c0_49 = arith.constant 0 : index
    %c0_50 = arith.constant 0 : index
    %c0_51 = arith.constant 0 : index
    %43 = vector.load %arg2[%c2_48, %c0_49, %c0_50, %c0_51] : memref<3x3x128x128xf32, #tpu.memory_space<vmem>>, vector<1x1x128x128xf32>
    %44 = vector.shape_cast %43 : vector<1x1x128x128xf32> to vector<128x128xf32>
    %c2_52 = arith.constant 2 : index
    %c1_53 = arith.constant 1 : index
    %c0_54 = arith.constant 0 : index
    %c0_55 = arith.constant 0 : index
    %45 = vector.load %arg2[%c2_52, %c1_53, %c0_54, %c0_55] : memref<3x3x128x128xf32, #tpu.memory_space<vmem>>, vector<1x1x128x128xf32>
    %46 = vector.shape_cast %45 : vector<1x1x128x128xf32> to vector<128x128xf32>
    %c2_56 = arith.constant 2 : index
    %c2_57 = arith.constant 2 : index
    %c0_58 = arith.constant 0 : index
    %c0_59 = arith.constant 0 : index
    %47 = vector.load %arg2[%c2_56, %c2_57, %c0_58, %c0_59] : memref<3x3x128x128xf32, #tpu.memory_space<vmem>>, vector<1x1x128x128xf32>
    %48 = vector.shape_cast %47 : vector<1x1x128x128xf32> to vector<128x128xf32>
    %49 = arith.mulf %46, %48 : vector<128x128xf32>
    %50 = arith.addf %44, %49 : vector<128x128xf32>
    %c2_60 = arith.constant 2 : index
    %c0_61 = arith.constant 0 : index
    %c0_62 = arith.constant 0 : index
    %c0_63 = arith.constant 0 : index
    %51 = vector.load %arg3[%c2_60, %c0_61, %c0_62, %c0_63] : memref<3x3x1x128xf32, #tpu.memory_space<vmem>>, vector<1x1x1x128xf32>
    %52 = vector.shape_cast %51 : vector<1x1x1x128xf32> to vector<1x128xf32>
    %c2_64 = arith.constant 2 : index
    %c1_65 = arith.constant 1 : index
    %c0_66 = arith.constant 0 : index
    %c0_67 = arith.constant 0 : index
    %53 = vector.load %arg3[%c2_64, %c1_65, %c0_66, %c0_67] : memref<3x3x1x128xf32, #tpu.memory_space<vmem>>, vector<1x1x1x128xf32>
    %54 = vector.shape_cast %53 : vector<1x1x1x128xf32> to vector<1x128xf32>
    %c2_68 = arith.constant 2 : index
    %c2_69 = arith.constant 2 : index
    %c0_70 = arith.constant 0 : index
    %c0_71 = arith.constant 0 : index
    %55 = vector.load %arg3[%c2_68, %c2_69, %c0_70, %c0_71] : memref<3x3x1x128xf32, #tpu.memory_space<vmem>>, vector<1x1x1x128xf32>
    %56 = vector.shape_cast %55 : vector<1x1x1x128xf32> to vector<1x128xf32>
    %57 = arith.mulf %54, %56 : vector<1x128xf32>
    %58 = arith.addf %52, %57 : vector<1x128xf32>
    %59 = arith.truncf %42 : vector<8x128xf32> to vector<8x128xbf16>
    %60 = arith.truncf %50 : vector<128x128xf32> to vector<128x128xbf16>
    %cst_72 = arith.constant dense<0.000000e+00> : vector<8x128xf32>
    %61 = tpu.matmul %59, %60, %cst_72 {dimension_numbers = #tpu.dot_dimension_numbers<[1], [0], [0], [1], [0, 0, 1, 1], [], []>} : vector<8x128xbf16>, vector<128x128xbf16>, vector<8x128xf32> -> vector<8x128xf32>
    %62 = vector.broadcast %58 : vector<1x128xf32> to vector<8x128xf32>
    %63 = arith.addf %61, %62 : vector<8x128xf32>
    %c0_73 = arith.constant 0 : index
    %c0_74 = arith.constant 0 : index
    %64 = vector.load %arg4[%c0_73, %c0_74] : memref<8x128xf32, #tpu.memory_space<vmem>>, vector<8x128xf32>
    tpu.vector_store %arg4[%c0_73, %c0_74], %63 {strides = array<i32>} : memref<8x128xf32, #tpu.memory_space<vmem>>, vector<8x128xf32>,
    return
  }
  func.func @transform_0(%arg0: i32) -> (i32, i32) {
    %c0_i32 = arith.constant 0 : i32
    %c0_i32_0 = arith.constant 0 : i32
    return %arg0, %c0_i32 : i32, i32
  }
  func.func @transform_1(%arg0: i32) -> (i32, i32, i32, i32) {
    %c0_i32 = arith.constant 0 : i32
    %c0_i32_0 = arith.constant 0 : i32
    %c0_i32_1 = arith.constant 0 : i32
    %c0_i32_2 = arith.constant 0 : i32
    %c0_i32_3 = arith.constant 0 : i32
    return %c0_i32, %c0_i32_0, %c0_i32_1, %c0_i32_2 : i32, i32, i32, i32
  }
  func.func @transform_2(%arg0: i32) -> (i32, i32, i32, i32) {
    %c0_i32 = arith.constant 0 : i32
    %c0_i32_0 = arith.constant 0 : i32
    %c0_i32_1 = arith.constant 0 : i32
    %c0_i32_2 = arith.constant 0 : i32
    %c0_i32_3 = arith.constant 0 : i32
    return %c0_i32, %c0_i32_0, %c0_i32_1, %c0_i32_2 : i32, i32, i32, i32
  }
  func.func @transform_3(%arg0: i32) -> (i32, i32) {
    %c0_i32 = arith.constant 0 : i32
    %c0_i32_0 = arith.constant 0 : i32
    return %arg0, %c0_i32 : i32, i32
  }
}

</mosaic_0001>

<bundles_post_ra>
// kernel: tpu_custom_call.1
= control target key start
LH: loop header
LB: loop body
LE: loop exit
PB: predicated region body
PF: predicated region fallthrough
CT: control target
= control target key end

     0   :  { %8 = vsyncpa [#allocation3], 0  ;;  %s808_s0 = inlined_call_operand.hbm [shape: f32[8,128], index: 0, kind: input, shape index: {}]   ;;  %s809_s1 = inlined_call_operand.hbm [shape: f32[3,3,128,128], index: 1, kind: input, shape index: {}]   ;;  %s810_s2 = inlined_call_operand.hbm [shape: f32[3,3,1,128], index: 2, kind: input, shape index: {}]   ;;  %s811_s3 = inlined_call_operand.hbm [shape: f32[8,128], index: 3, kind: output, shape index: {}]  }
   0x1   :  { %9 = vsyncpa [#allocation6], 0 }
   0x2   :  { %10 = vsyncpa [#allocation4], 0  ;;  %s700_s12 = smov [#allocation5]   ;;  %s606_s16 = scalar_lea.hbm %s809_s1, 18432 }
   0x3   :  { %s26_s13 = sshll.u32 %s700_s12, 4  ;;  %p607_p0 = scmp.ne.s32.totalorder %s809_s1, %s606_s16  ;;  %s27_s13 = int_to_ptr.vmem [resolvable:$true] %s26_s13 }
   0x4   :  { %p610_p1 = scmp.lt.u32.totalorder %s606_s16, %s809_s1 }
   0x6   :  { %p612_p2 = pnand %p610_p1, %p607_p0 }
   0x8   :  { %615 = shalt.err (!%p612_p2)
}
   0x9   :  { %s616_s21 = scalar_lea.vmem %s27_s13, 18432  ;;  %p621_p4 = scmp.lt.s32.totalorder %s27_s13, %s27_s13 }
   0xa   :  { %p617_p3 = scmp.ne.s32.totalorder %s27_s13, %s616_s21  ;;  %p622_p5 = scmp.lt.s32.totalorder %s616_s21, %s616_s21 }
   0xc   :  { %p623_p6 = por %p622_p5, %p621_p4 }
   0xe   :  { %p624_p7 = pnand %p623_p6, %p617_p3 }
  0x10   :  { %627 = shalt.err (!%p624_p7)
}
  0x11   :  { %s701_s22 = smov 128   ;;  %s702_s23 = smov 8  }
  0x12   :  { %32 = dma.hbm_to_vmem [thread:$0]  %s809_s1, 18432, %s27_s13, [#allocation6], %s701_s22, %s701_s22, %s702_s23  }
  0x13   :  { %s703_s26 = smov [#allocation2]   ;;  %s704_s28 = smov [#allocation7]  }
  0x14   :  { %s17_s27 = sshll.u32 %s703_s26, 4  ;;  %s38_s29 = sshll.u32 %s704_s28, 4  ;;  %s18_s27 = int_to_ptr.vmem [resolvable:$true] %s17_s27  ;;  %s39_s29 = int_to_ptr.vmem [resolvable:$true] %s38_s29 }
  0x15   :  { %s628_s5 = scalar_lea.hbm %s808_s0, 128 }
  0x16   :  { %p629_p8 = scmp.ne.s32.totalorder %s808_s0, %s628_s5  ;;  %p632_p9 = scmp.lt.u32.totalorder %s628_s5, %s808_s0 }
  0x18   :  { %p634_p10 = pnand %p632_p9, %p629_p8 }
  0x1a   :  { %637 = shalt.err (!%p634_p10)
}
  0x1b   :  { %s638_s1 = scalar_lea.vmem %s18_s27, 128  ;;  %p643_p12 = scmp.lt.s32.totalorder %s18_s27, %s18_s27 }
  0x1c   :  { %p639_p11 = scmp.ne.s32.totalorder %s18_s27, %s638_s1  ;;  %p644_p13 = scmp.lt.s32.totalorder %s638_s1, %s638_s1 }
  0x1e   :  { %p645_p0 = por %p644_p13, %p643_p12 }
  0x20   :  { %p646_p1 = pnand %p645_p0, %p639_p11 }
  0x22   :  { %649 = shalt.err (!%p646_p1)
}
  0x23   :  { %20 = dma.hbm_to_vmem [thread:$0]  %s808_s0, 128, %s18_s27, [#allocation3]  }
  0x24   :  { %s650_s14 = scalar_lea.hbm %s810_s2, 144 }
  0x25   :  { %p651_p2 = scmp.ne.s32.totalorder %s810_s2, %s650_s14  ;;  %p654_p3 = scmp.lt.u32.totalorder %s650_s14, %s810_s2 }
  0x27   :  { %p656_p4 = pnand %p654_p3, %p651_p2 }
  0x29   :  { %659 = shalt.err (!%p656_p4)
}
  0x2a   :  { %s660_s19 = scalar_lea.vmem %s39_s29, 144  ;;  %s664_s20 = scalar_lea.vmem %s39_s29, 160 }
  0x2b   :  { %p661_p5 = scmp.ne.s32.totalorder %s39_s29, %s660_s19  ;;  %p665_p6 = scmp.lt.s32.totalorder %s39_s29, %s39_s29 }
  0x2c   :  { %p666_p7 = scmp.lt.s32.totalorder %s664_s20, %s660_s19 }
  0x2e   :  { %p667_p8 = por %p666_p7, %p665_p6 }
  0x30   :  { %p668_p9 = pnand %p667_p8, %p661_p5 }
  0x32   :  { %671 = shalt.err (!%p668_p9)
}
  0x33   :  { %s705_s0 = smov 16   ;;  %s706_s21 = smov 1  }
  0x34   :  { %44 = dma.hbm_to_vmem [thread:$0]  %s810_s2, 144, %s39_s29, [#allocation6], %s705_s0, %s705_s0, %s706_s21  }
  0x35   :  { %694 = dma.done.wait [#allocation3], 128  }
  0x36   :  { %695 = vsyncadd [#allocation3], 4294967168 }
  0x37   :  { %696 = dma.done.wait [#allocation6], 18576  }
  0x38   :  { %697 = vsyncadd [#allocation6], 4294948720  ;;  %v707_v0 = vmov 0.0   ;;  %vm708_vm0 = vmmov 0   ;;  %v56_v1 = vld [vmem:[#allocation5] sm:$0xff]  ;;  %v57_v2 = vld [vmem:[#allocation5 + $0x8] sm:$0xff] }
  0x39   :  { %536 = vmatprep.subr.bf16.mxu0 %v707_v0  ;;  %552 = vmatprep.mubr.msk.bf16.mxu0 %vm708_vm0, %v707_v0  ;;  %v73_v3 = vld [vmem:[#allocation5 + $0x80] sm:$0xff]  ;;  %v74_v4 = vld [vmem:[#allocation5 + $0x88] sm:$0xff]  ;;  %v58_v9 = vld [vmem:[#allocation5 + $0x10] sm:$0xff]  ;;  %s709_s2 = smov [#allocation8]  }
  0x3a   :  { %556 = vmatprep.subr.bf16.mxu1 %v707_v0  ;;  %572 = vmatprep.mubr.msk.bf16.mxu1 %vm708_vm0, %v707_v0  ;;  %v90_v5 = vld [vmem:[#allocation5 + $0x100] sm:$0xff]  ;;  %v91_v6 = vld [vmem:[#allocation5 + $0x108] sm:$0xff]  ;;  %v59_v10 = vld [vmem:[#allocation5 + $0x18] sm:$0xff]  ;;  %s499_s24 = sshll.u32 %s709_s2, 4  ;;  %s500_s24 = int_to_ptr.vmem [resolvable:$true] %s499_s24 }
  0x3b   :  { %v106_v7 = vmul.f32 %v90_v5, %v73_v3  ;;  %v107_v8 = vmul.f32 %v91_v6, %v74_v4  ;;  %v75_v11 = vld [vmem:[#allocation5 + $0x90] sm:$0xff]  ;;  %v76_v12 = vld [vmem:[#allocation5 + $0x98] sm:$0xff]  ;;  %v60_v19 = vld [vmem:[#allocation5 + $0x20] sm:$0xff]  ;;  %s672_s25 = scalar_lea.vmem %s500_s24, 128  ;;  %p677_p11 = scmp.lt.s32.totalorder %s500_s24, %s500_s24 }
  0x3c   :  { %v92_v13 = vld [vmem:[#allocation5 + $0x110] sm:$0xff]  ;;  %v93_v14 = vld [vmem:[#allocation5 + $0x118] sm:$0xff]  ;;  %v77_v20 = vld [vmem:[#allocation5 + $0xa0] sm:$0xff]  ;;  %p673_p10 = scmp.ne.s32.totalorder %s500_s24, %s672_s25  ;;  %p678_p12 = scmp.lt.s32.totalorder %s672_s25, %s672_s25 }
  0x3d   :  { %v122_v15 = vadd.f32 %v106_v7, %v56_v1  ;;  %v123_v16 = vadd.f32 %v107_v8, %v57_v2  ;;  %v108_v17 = vmul.f32 %v92_v13, %v75_v11  ;;  %v109_v18 = vmul.f32 %v93_v14, %v76_v12  ;;  %v78_v21 = vld [vmem:[#allocation5 + $0xa8] sm:$0xff]  ;;  %v94_v22 = vld [vmem:[#allocation5 + $0x120] sm:$0xff]  ;;  %v79_v29 = vld [vmem:[#allocation5 + $0xb0] sm:$0xff] }
  0x3e   :  { %v95_v23 = vld [vmem:[#allocation5 + $0x128] sm:$0xff]  ;;  %v110_v28 = vmul.f32 %v94_v22, %v77_v20  ;;  %v80_v31 = vld [vmem:[#allocation5 + $0xb8] sm:$0xff]  ;;  %v96_v32 = vld [vmem:[#allocation5 + $0x130] sm:$0xff]  ;;  %p679_p13 = por %p678_p12, %p677_p11 }
  0x3f   :  { %v146_v24 = vpack.c.bf16 %v123_v16, %v122_v15  ;;  %v124_v25 = vadd.f32 %v108_v17, %v58_v9  ;;  %v125_v26 = vadd.f32 %v109_v18, %v59_v10  ;;  %v61_v27 = vld [vmem:[#allocation5 + $0x28] sm:$0xff]  ;;  %v111_v30 = vmul.f32 %v95_v23, %v78_v21  ;;  %v97_v33 = vld [vmem:[#allocation5 + $0x138] sm:$0xff]  ;;  %v62_v36 = vld [vmem:[#allocation5 + $0x30] sm:$0xff] }
  0x40   :  { %v126_v35 = vadd.f32 %v110_v28, %v60_v19  ;;  %v63_v37 = vld [vmem:[#allocation5 + $0x38] sm:$0xff]  ;;  %v112_v38 = vmul.f32 %v96_v32, %v79_v29  ;;  %v113_v39 = vmul.f32 %v97_v33, %v80_v31  ;;  %v81_v40 = vld [vmem:[#allocation5 + $0xc0] sm:$0xff]  ;;  %v82_v42 = vld [vmem:[#allocation5 + $0xc8] sm:$0xff]  ;;  %p680_p0 = pnand %p679_p13, %p673_p10 }
  0x41   :  { %537 = vmatpush3.bf16.msra.mxu0 %v146_v24  ;;  %v147_v34 = vpack.c.bf16 %v125_v26, %v124_v25  ;;  %v127_v41 = vadd.f32 %v111_v30, %v61_v27  ;;  %v98_v43 = vld [vmem:[#allocation5 + $0x140] sm:$0xff]  ;;  %v99_v44 = vld [vmem:[#allocation5 + $0x148] sm:$0xff]  ;;  %v83_v52 = vld [vmem:[#allocation5 + $0xd0] sm:$0xff] }
  0x42   :  { %538 = vmatprep.subr.bf16.mxu0 %v707_v0  ;;  %v114_v45 = vmul.f32 %v98_v43, %v81_v40  ;;  %v115_v46 = vmul.f32 %v99_v44, %v82_v42  ;;  %v128_v48 = vadd.f32 %v112_v38, %v62_v36  ;;  %v129_v49 = vadd.f32 %v113_v39, %v63_v37  ;;  %v64_v50 = vld [vmem:[#allocation5 + $0x40] sm:$0xff]  ;;  %v65_v51 = vld [vmem:[#allocation5 + $0x48] sm:$0xff]  ;;  %v84_v53 = vld [vmem:[#allocation5 + $0xd8] sm:$0xff] }
  0x43   :  { %v148_v47 = vpack.c.bf16 %v127_v41, %v126_v35  ;;  %v100_v54 = vld [vmem:[#allocation5 + $0x150] sm:$0xff]  ;;  %v101_v55 = vld [vmem:[#allocation5 + $0x158] sm:$0xff]  ;;  %v85_v56 = vld [vmem:[#allocation5 + $0xe0] sm:$0xff] }
  0x44   :  { %v130_v57 = vadd.f32 %v114_v45, %v64_v50  ;;  %v131_v58 = vadd.f32 %v115_v46, %v65_v51  ;;  %v86_v59 = vld [vmem:[#allocation5 + $0xe8] sm:$0xff]  ;;  %v102_v60 = vld [vmem:[#allocation5 + $0x160] sm:$0xff]  ;;  %v149_v62 = vpack.c.bf16 %v129_v49, %v128_v48  ;;  %v66_v63 = vld [vmem:[#allocation5 + $0x50] sm:$0xff]  ;;  %v116_v2 = vmul.f32 %v100_v54, %v83_v52 }
  0x45   :  { %539 = vmatpush3.bf16.msra.mxu0 %v147_v34  ;;  %v103_v61 = vld [vmem:[#allocation5 + $0x168] sm:$0xff]  ;;  %v67_v1 = vld [vmem:[#allocation5 + $0x58] sm:$0xff]  ;;  %v117_v3 = vmul.f32 %v101_v55, %v84_v53  ;;  %v201_v4 = vld [vmem:[#allocation5 + $0x180] sm:$0xff]  ;;  %v118_v10 = vmul.f32 %v102_v60, %v85_v56 }
  0x46   :  { %540 = vmatprep.subr.bf16.mxu0 %v707_v0  ;;  %v68_v5 = vld [vmem:[#allocation5 + $0x60] sm:$0xff]  ;;  %v69_v6 = vld [vmem:[#allocation5 + $0x68] sm:$0xff]  ;;  %v119_v11 = vmul.f32 %v103_v61, %v86_v59  ;;  %v87_v12 = vld [vmem:[#allocation5 + $0xf0] sm:$0xff]  ;;  %v150_v18 = vpack.c.bf16 %v131_v58, %v130_v57  ;;  %v132_v25 = vadd.f32 %v116_v2, %v66_v63 }
  0x47   :  { %v218_v7 = vld [vmem:[#allocation5 + $0x200] sm:$0xff]  ;;  %v219_v8 = vld [vmem:[#allocation5 + $0x208] sm:$0xff]  ;;  %v104_v13 = vld [vmem:[#allocation5 + $0x170] sm:$0xff]  ;;  %v133_v26 = vadd.f32 %v117_v3, %v67_v1  ;;  %v134_v37 = vadd.f32 %v118_v10, %v68_v5 }
  0x48   :  { %v235_v9 = vld [vmem:[#allocation5 + $0x280] sm:$0xff]  ;;  %v202_v14 = vld [vmem:[#allocation5 + $0x188] sm:$0xff]  ;;  %v203_v17 = vld [vmem:[#allocation5 + $0x190] sm:$0xff]  ;;  %v135_v38 = vadd.f32 %v119_v11, %v69_v6  ;;  %v120_v43 = vmul.f32 %v104_v13, %v87_v12 }
  0x49   :  { %541 = vmatpush3.bf16.msra.mxu0 %v148_v47  ;;  %v236_v15 = vld [vmem:[#allocation5 + $0x288] sm:$0xff]  ;;  %v251_v16 = vmul.f32 %v235_v9, %v218_v7  ;;  %v88_v19 = vld [vmem:[#allocation5 + $0xf8] sm:$0xff]  ;;  %v220_v22 = vld [vmem:[#allocation5 + $0x210] sm:$0xff]  ;;  %v151_v50 = vpack.c.bf16 %v133_v26, %v132_v25 }
  0x4a   :  { %542 = vmatprep.subr.bf16.mxu0 %v707_v0  ;;  %v105_v20 = vld [vmem:[#allocation5 + $0x178] sm:$0xff]  ;;  %v252_v21 = vmul.f32 %v236_v15, %v219_v8  ;;  %v237_v24 = vld [vmem:[#allocation5 + $0x290] sm:$0xff]  ;;  %v205_v31 = vld [vmem:[#allocation5 + $0x1a0] sm:$0xff]  ;;  %v152_v3 = vpack.c.bf16 %v135_v38, %v134_v37 }
  0x4b   :  { %v221_v23 = vld [vmem:[#allocation5 + $0x218] sm:$0xff]  ;;  %v267_v27 = vadd.f32 %v251_v16, %v201_v4  ;;  %v253_v30 = vmul.f32 %v237_v24, %v220_v22  ;;  %v222_v34 = vld [vmem:[#allocation5 + $0x220] sm:$0xff]  ;;  %v223_v35 = vld [vmem:[#allocation5 + $0x228] sm:$0xff]  ;;  %v121_v53 = vmul.f32 %v105_v20, %v88_v19 }
  0x4c   :  { %v204_v28 = vld [vmem:[#allocation5 + $0x198] sm:$0xff]  ;;  %v268_v32 = vadd.f32 %v252_v21, %v202_v14  ;;  %v239_v36 = vld [vmem:[#allocation5 + $0x2a0] sm:$0xff]  ;;  %v206_v40 = vld [vmem:[#allocation5 + $0x1a8] sm:$0xff] }
  0x4d   :  { %543 = vmatpush3.bf16.msra.mxu0 %v149_v62  ;;  %v238_v29 = vld [vmem:[#allocation5 + $0x298] sm:$0xff]  ;;  %v269_v39 = vadd.f32 %v253_v30, %v203_v17  ;;  %v240_v41 = vld [vmem:[#allocation5 + $0x2a8] sm:$0xff]  ;;  %v255_v42 = vmul.f32 %v239_v36, %v222_v34  ;;  %v224_v47 = vld [vmem:[#allocation5 + $0x230] sm:$0xff] }
  0x4e   :  { %544 = vmatprep.subr.bf16.mxu0 %v707_v0  ;;  %v254_v33 = vmul.f32 %v238_v29, %v221_v23  ;;  %v292_v44 = vpack.c.bf16 %v268_v32, %v267_v27  ;;  %v256_v46 = vmul.f32 %v240_v41, %v223_v35  ;;  %v225_v48 = vld [vmem:[#allocation5 + $0x238] sm:$0xff]  ;;  %v241_v49 = vld [vmem:[#allocation5 + $0x2b0] sm:$0xff]  ;;  %v226_v61 = vld [vmem:[#allocation5 + $0x240] sm:$0xff] }
  0x4f   :  { %v70_v51 = vld [vmem:[#allocation5 + $0x70] sm:$0xff]  ;;  %v71_v52 = vld [vmem:[#allocation5 + $0x78] sm:$0xff]  ;;  %v271_v54 = vadd.f32 %v255_v42, %v205_v31  ;;  %v257_v56 = vmul.f32 %v241_v49, %v224_v47  ;;  %v243_v62 = vld [vmem:[#allocation5 + $0x2c0] sm:$0xff] }
  0x50   :  { %v270_v45 = vadd.f32 %v254_v33, %v204_v28  ;;  %v242_v55 = vld [vmem:[#allocation5 + $0x2b8] sm:$0xff]  ;;  %557 = vmatpush3.bf16.msra.mxu1 %v292_v44  ;;  %v272_v58 = vadd.f32 %v256_v46, %v206_v40  ;;  %v207_v59 = vld [vmem:[#allocation5 + $0x1b0] sm:$0xff]  ;;  %v227_v1 = vld [vmem:[#allocation5 + $0x248] sm:$0xff]  ;;  %v136_v4 = vadd.f32 %v120_v43, %v70_v51  ;;  %v137_v5 = vadd.f32 %v121_v53, %v71_v52 }
  0x51   :  { %545 = vmatpush3.bf16.msra.mxu0 %v150_v18  ;;  %v258_v60 = vmul.f32 %v242_v55, %v225_v48  ;;  %558 = vmatprep.subr.bf16.mxu1 %v707_v0  ;;  %v208_v63 = vld [vmem:[#allocation5 + $0x1b8] sm:$0xff]  ;;  %v244_v2 = vld [vmem:[#allocation5 + $0x2c8] sm:$0xff]  ;;  %v273_v6 = vadd.f32 %v257_v56, %v207_v59  ;;  %v259_v7 = vmul.f32 %v243_v62, %v226_v61  ;;  %v209_v10 = vld [vmem:[#allocation5 + $0x1c0] sm:$0xff] }
  0x52   :  { %546 = vmatprep.subr.bf16.mxu0 %v707_v0  ;;  %v293_v57 = vpack.c.bf16 %v270_v45, %v269_v39  ;;  %v294_v8 = vpack.c.bf16 %v272_v58, %v271_v54  ;;  %v260_v11 = vmul.f32 %v244_v2, %v227_v1  ;;  %v228_v12 = vld [vmem:[#allocation5 + $0x250] sm:$0xff]  ;;  %v210_v14 = vld [vmem:[#allocation5 + $0x1c8] sm:$0xff]  ;;  %v229_v15 = vld [vmem:[#allocation5 + $0x258] sm:$0xff]  ;;  %v153_v17 = vpack.c.bf16 %v137_v5, %v136_v4 }
  0x53   :  { %v274_v9 = vadd.f32 %v258_v60, %v208_v63  ;;  %v245_v13 = vld [vmem:[#allocation5 + $0x2d0] sm:$0xff]  ;;  %v246_v16 = vld [vmem:[#allocation5 + $0x2d8] sm:$0xff]  ;;  %v275_v19 = vadd.f32 %v259_v7, %v209_v10  ;;  %v230_v25 = vld [vmem:[#allocation5 + $0x260] sm:$0xff] }
  0x54   :  { %559 = vmatpush3.bf16.msra.mxu1 %v293_v57  ;;  %v55_v18 = vld [vmem:[#allocation2] sm:$0xff]  ;;  %v261_v20 = vmul.f32 %v245_v13, %v228_v12  ;;  %v276_v22 = vadd.f32 %v260_v11, %v210_v14  ;;  %v211_v23 = vld [vmem:[#allocation5 + $0x1d0] sm:$0xff]  ;;  %v262_v24 = vmul.f32 %v246_v16, %v229_v15  ;;  %v247_v26 = vld [vmem:[#allocation5 + $0x2e0] sm:$0xff] }
  0x55   :  { %547 = vmatpush3.bf16.msra.mxu0 %v151_v50  ;;  %560 = vmatprep.subr.bf16.mxu1 %v707_v0  ;;  %v295_v21 = vpack.c.bf16 %v274_v9, %v273_v6  ;;  %v212_v27 = vld [vmem:[#allocation5 + $0x1d8] sm:$0xff]  ;;  %v231_v28 = vld [vmem:[#allocation5 + $0x268] sm:$0xff]  ;;  %v145_v30 = vpack.c.bf16 %v55_v18, %v55_v18  ;;  %v263_v32 = vmul.f32 %v247_v26, %v230_v25  ;;  %v213_v36 = vld [vmem:[#allocation5 + $0x1e0] sm:$0xff] }
  0x56   :  { %548 = vmatprep.subr.bf16.mxu0 %v707_v0  ;;  %v248_v29 = vld [vmem:[#allocation5 + $0x2e8] sm:$0xff]  ;;  %v277_v31 = vadd.f32 %v261_v20, %v211_v23  ;;  %v296_v33 = vpack.c.bf16 %v276_v22, %v275_v19  ;;  %v278_v34 = vadd.f32 %v262_v24, %v212_v27  ;;  %v232_v42 = vld [vmem:[#allocation5 + $0x270] sm:$0xff]  ;;  %v233_v43 = vld [vmem:[#allocation5 + $0x278] sm:$0xff] }
  0x57   :  { %v264_v35 = vmul.f32 %v248_v29, %v231_v28  ;;  %v214_v37 = vld [vmem:[#allocation5 + $0x1e8] sm:$0xff]  ;;  %v279_v39 = vadd.f32 %v263_v32, %v213_v36  ;;  %v249_v44 = vld [vmem:[#allocation5 + $0x2f0] sm:$0xff]  ;;  %v250_v45 = vld [vmem:[#allocation5 + $0x2f8] sm:$0xff] }
  0x58   :  { %561 = vmatpush3.bf16.msra.mxu1 %v294_v8  ;;  %v297_v38 = vpack.c.bf16 %v278_v34, %v277_v31  ;;  %v265_v46 = vmul.f32 %v249_v44, %v232_v42  ;;  %v215_v47 = vld [vmem:[#allocation5 + $0x1f0] sm:$0xff]  ;;  %v216_v48 = vld [vmem:[#allocation5 + $0x1f8] sm:$0xff]  ;;  %v266_v49 = vmul.f32 %v250_v45, %v233_v43  ;;  %v347_v53 = vld [vmem:[#allocation5 + $0x300] sm:$0xff] }
  0x59   :  { %549 = vmatpush3.bf16.msra.mxu0 %v152_v3  ;;  %562 = vmatprep.subr.bf16.mxu1 %v707_v0  ;;  %v280_v40 = vadd.f32 %v264_v35, %v214_v37  ;;  %v348_v54 = vld [vmem:[#allocation5 + $0x308] sm:$0xff]  ;;  %v364_v55 = vld [vmem:[#allocation5 + $0x380] sm:$0xff]  ;;  %v349_v61 = vld [vmem:[#allocation5 + $0x310] sm:$0xff] }
  0x5a   :  { %550 = vmatprep.subr.bf16.mxu0 %v707_v0  ;;  %v281_v50 = vadd.f32 %v265_v46, %v215_v47  ;;  %v282_v51 = vadd.f32 %v266_v49, %v216_v48  ;;  %v365_v56 = vld [vmem:[#allocation5 + $0x388] sm:$0xff]  ;;  %v381_v57 = vld [vmem:[#allocation5 + $0x400] sm:$0xff]  ;;  %v350_v62 = vld [vmem:[#allocation5 + $0x318] sm:$0xff] }
  0x5b   :  { %v298_v41 = vpack.c.bf16 %v280_v40, %v279_v39  ;;  %v382_v58 = vld [vmem:[#allocation5 + $0x408] sm:$0xff]  ;;  %v397_v59 = vmul.f32 %v381_v57, %v364_v55  ;;  %v366_v63 = vld [vmem:[#allocation5 + $0x390] sm:$0xff]  ;;  %v367_v1 = vld [vmem:[#allocation5 + $0x398] sm:$0xff] }
  0x5c   :  { %563 = vmatpush3.bf16.msra.mxu1 %v295_v21  ;;  %v299_v52 = vpack.c.bf16 %v282_v51, %v281_v50  ;;  %v398_v60 = vmul.f32 %v382_v58, %v365_v56  ;;  %v383_v2 = vld [vmem:[#allocation5 + $0x410] sm:$0xff]  ;;  %v384_v3 = vld [vmem:[#allocation5 + $0x418] sm:$0xff]  ;;  %v351_v8 = vld [vmem:[#allocation5 + $0x320] sm:$0xff] }
  0x5d   :  { %551 = vmatpush3.bf16.msra.mxu0 %v153_v17  ;;  %564 = vmatprep.subr.bf16.mxu1 %v707_v0  ;;  %v413_v4 = vadd.f32 %v397_v59, %v347_v53  ;;  %v399_v6 = vmul.f32 %v383_v2, %v366_v63  ;;  %v400_v7 = vmul.f32 %v384_v3, %v367_v1  ;;  %v368_v9 = vld [vmem:[#allocation5 + $0x3a0] sm:$0xff]  ;;  %v369_v10 = vld [vmem:[#allocation5 + $0x3a8] sm:$0xff]  ;;  %v370_v18 = vld [vmem:[#allocation5 + $0x3b0] sm:$0xff] }
  0x5e   :  { %576 = vmatprep.subr.bf16.mxu0 %v707_v0  ;;  %v414_v5 = vadd.f32 %v398_v60, %v348_v54  ;;  %v385_v11 = vld [vmem:[#allocation5 + $0x420] sm:$0xff]  ;;  %v386_v12 = vld [vmem:[#allocation5 + $0x428] sm:$0xff]  ;;  %v371_v20 = vld [vmem:[#allocation5 + $0x3b8] sm:$0xff] }
  0x5f   :  { %v415_v14 = vadd.f32 %v399_v6, %v349_v61  ;;  %v416_v15 = vadd.f32 %v400_v7, %v350_v62  ;;  %v352_v16 = vld [vmem:[#allocation5 + $0x328] sm:$0xff]  ;;  %v401_v17 = vmul.f32 %v385_v11, %v368_v9  ;;  %v402_v19 = vmul.f32 %v386_v12, %v369_v10  ;;  %v387_v21 = vld [vmem:[#allocation5 + $0x430] sm:$0xff]  ;;  %v388_v22 = vld [vmem:[#allocation5 + $0x438] sm:$0xff] }
  0x60   :  { %553 = vmatmul.mubr.bf16.vlgmr.msra.gmra.mrb[0].mxu0 %v145_v30  ;;  %565 = vmatpush3.bf16.msra.mxu1 %v296_v33  ;;  %v438_v13 = vpack.c.bf16 %v414_v5, %v413_v4  ;;  %v353_v25 = vld [vmem:[#allocation5 + $0x330] sm:$0xff]  ;;  %v354_v26 = vld [vmem:[#allocation5 + $0x338] sm:$0xff]  ;;  %v403_v27 = vmul.f32 %v387_v21, %v370_v18  ;;  %v404_v28 = vmul.f32 %v388_v22, %v371_v20  ;;  %v372_v29 = vld [vmem:[#allocation5 + $0x3c0] sm:$0xff]  ;;  %v155_v4 = vlaneseq }
  0x61   :  { %592 = vmatprep.mubr.msk.bf16.mxu0 %vm708_vm0, %v707_v0  ;;  %566 = vmatprep.subr.bf16.mxu1 %v707_v0  ;;  %v439_v23 = vpack.c.bf16 %v416_v15, %v415_v14  ;;  %v417_v24 = vadd.f32 %v401_v17, %v351_v8  ;;  %v418_v30 = vadd.f32 %v402_v19, %v352_v16  ;;  %v373_v31 = vld [vmem:[#allocation5 + $0x3c8] sm:$0xff]  ;;  %v389_v32 = vld [vmem:[#allocation5 + $0x440] sm:$0xff]  ;;  %v375_v42 = vld [vmem:[#allocation5 + $0x3d8] sm:$0xff] }
  0x62   :  { %577 = vmatpush3.bf16.msra.mxu0 %v438_v13  ;;  %v390_v33 = vld [vmem:[#allocation5 + $0x448] sm:$0xff]  ;;  %v405_v34 = vmul.f32 %v389_v32, %v372_v29  ;;  %v419_v37 = vadd.f32 %v403_v27, %v353_v25  ;;  %v355_v39 = vld [vmem:[#allocation5 + $0x340] sm:$0xff]  ;;  %v391_v43 = vld [vmem:[#allocation5 + $0x450] sm:$0xff]  ;;  %v156_v8 = vshrl.u32 %v155_v4, 7 }
  0x63   :  { %578 = vmatprep.subr.bf16.mxu0 %v707_v0  ;;  %v406_v35 = vmul.f32 %v390_v33, %v373_v31  ;;  %v440_v36 = vpack.c.bf16 %v418_v30, %v417_v24  ;;  %v356_v40 = vld [vmem:[#allocation5 + $0x348] sm:$0xff]  ;;  %v392_v44 = vld [vmem:[#allocation5 + $0x458] sm:$0xff]  ;;  %v357_v48 = vld [vmem:[#allocation5 + $0x350] sm:$0xff] }
  0x64   :  { %567 = vmatpush3.bf16.msra.mxu1 %v297_v38  ;;  %v420_v38 = vadd.f32 %v404_v28, %v354_v26  ;;  %v421_v45 = vadd.f32 %v405_v34, %v355_v39  ;;  %v358_v49 = vld [vmem:[#allocation5 + $0x358] sm:$0xff]  ;;  %v408_v51 = vmul.f32 %v392_v44, %v375_v42  ;;  %v377_v53 = vld [vmem:[#allocation5 + $0x3e8] sm:$0xff]  ;;  %v393_v54 = vld [vmem:[#allocation5 + $0x460] sm:$0xff]  ;;  %v157_v11 = vsub.s32 0, %v156_v8 }
  0x65   :  { %568 = vmatprep.subr.bf16.mxu1 %v707_v0  ;;  %v422_v46 = vadd.f32 %v406_v35, %v356_v40  ;;  %v394_v55 = vld [vmem:[#allocation5 + $0x468] sm:$0xff]  ;;  %v359_v61 = vld [vmem:[#allocation5 + $0x360] sm:$0xff]  ;;  %v378_v19 = vld [vmem:[#allocation5 + $0x3f0] sm:$0xff] }
  0x66   :  { %579 = vmatpush3.bf16.msra.mxu0 %v439_v23  ;;  %v441_v47 = vpack.c.bf16 %v420_v38, %v419_v37  ;;  %v424_v58 = vadd.f32 %v408_v51, %v358_v49  ;;  %v410_v60 = vmul.f32 %v394_v55, %v377_v53  ;;  %v360_v62 = vld [vmem:[#allocation5 + $0x368] sm:$0xff]  ;;  %v140_v5 = vld [vmem:[#allocation7 + $0x1] sm:$0x1]  ;;  %v142_v6 = vld [vmem:[#allocation7 + $0x2] sm:$0x1] }
  0x67   :  { %580 = vmatprep.subr.bf16.mxu0 %v707_v0  ;;  %v442_v56 = vpack.c.bf16 %v422_v46, %v421_v45  ;;  %v143_v7 = vmul.f32 %v142_v6, %v140_v5  ;;  %v138_v9 = vld [vmem:[#allocation7] sm:$0x1]  ;;  %v379_v20 = vld [vmem:[#allocation5 + $0x3f8] sm:$0xff]  ;;  %v395_v21 = vld [vmem:[#allocation5 + $0x470] sm:$0xff] }
  0x68   :  { %569 = vmatpush3.bf16.msra.mxu1 %v298_v41  ;;  %v374_v41 = vld [vmem:[#allocation5 + $0x3d0] sm:$0xff]  ;;  %v426_v2 = vadd.f32 %v410_v60, %v360_v62  ;;  %v411_v22 = vmul.f32 %v395_v21, %v378_v19  ;;  %v362_v24 = vld [vmem:[#allocation5 + $0x378] sm:$0xff]  ;;  %v286_v29 = vld [vmem:[#allocation7 + $0x4] sm:$0x1] }
  0x69   :  { %570 = vmatprep.subr.bf16.mxu1 %v707_v0  ;;  %v407_v50 = vmul.f32 %v391_v43, %v374_v41  ;;  %v144_v10 = vadd.f32 %v143_v7, %v138_v9  ;;  %v361_v23 = vld [vmem:[#allocation5 + $0x370] sm:$0xff]  ;;  %v288_v30 = vld [vmem:[#allocation7 + $0x5] sm:$0x1]  ;;  %v284_v32 = vld [vmem:[#allocation7 + $0x3] sm:$0x1] }
  0x6a   :  { %581 = vmatpush3.bf16.msra.mxu0 %v440_v36  ;;  %v427_v26 = vadd.f32 %v411_v22, %v361_v23  ;;  %v289_v31 = vmul.f32 %v288_v30, %v286_v29  ;;  %v432_v41 = vld [vmem:[#allocation7 + $0x7] sm:$0x1]  ;;  %v434_v42 = vld [vmem:[#allocation7 + $0x8] sm:$0x1]  ;;  %v430_v44 = vld [vmem:[#allocation7 + $0x6] sm:$0x1] }
  0x6b   :  { %582 = vmatprep.subr.bf16.mxu0 %v707_v0  ;;  %v423_v57 = vadd.f32 %v407_v50, %v357_v48  ;;  %v158_v12 = vrot.slane %v144_v10, %v157_v11  ;;  %v435_v43 = vmul.f32 %v434_v42, %v432_v41 }
  0x6c   :  { %571 = vmatpush3.bf16.msra.mxu1 %v299_v52  ;;  %v376_v52 = vld [vmem:[#allocation5 + $0x3e0] sm:$0xff]  ;;  %v290_v33 = vadd.f32 %v289_v31, %v284_v32 }
  0x6d   :  { %v409_v59 = vmul.f32 %v393_v54, %v376_v52  ;;  %v443_v63 = vpack.c.bf16 %v424_v58, %v423_v57  ;;  %v436_v45 = vadd.f32 %v435_v43, %v430_v44 }
  0x6e   :  { %583 = vmatpush3.bf16.msra.mxu0 %v441_v47  ;;  %v304_v34 = vrot.slane %v290_v33, %v157_v11 }
  0x6f   :  { %584 = vmatprep.subr.bf16.mxu0 %v707_v0  ;;  %v425_v1 = vadd.f32 %v409_v59, %v359_v61  ;;  %v450_v46 = vrot.slane %v436_v45, %v157_v11 }
  0x71   :  { %v444_v3 = vpack.c.bf16 %v426_v2, %v425_v1 }
  0x72   :  { %585 = vmatpush3.bf16.msra.mxu0 %v442_v56 }
  0x73   :  { %586 = vmatprep.subr.bf16.mxu0 %v707_v0 }
  0x76   :  { %587 = vmatpush3.bf16.msra.mxu0 %v443_v63 }
  0x77   :  { %588 = vmatprep.subr.bf16.mxu0 %v707_v0 }
  0x7a   :  { %589 = vmatpush3.bf16.msra.mxu0 %v444_v3 }
  0x7b   :  { %590 = vmatprep.subr.bf16.mxu0 %v707_v0  ;;  %v396_v0 = vld [vmem:[#allocation5 + $0x478] sm:$0xff] }
  0x7c   :  { %v412_v25 = vmul.f32 %v396_v0, %v379_v20 }
  0x7e   :  { %v428_v27 = vadd.f32 %v412_v25, %v362_v24 }
  0x80   :  { %v445_v28 = vpack.c.bf16 %v428_v27, %v427_v26 }
  0x82   :  { %591 = vmatpush3.bf16.msra.mxu0 %v445_v28 }
 0x133   :  { %v194_v13 = vpop.f32.mrb[0].mxu0 }
 0x134   :  { %v195_v14 = vadd.f32 %v194_v13, %v158_v12  ;;  %v554_v15 = vpop.f32.mrb[1].mxu0 }
 0x135   :  { %v197_v16 = vpop.f32.mrb[2].mxu0 }
 0x136   :  { %v291_v17 = vpack.c.bf16 %v195_v14, %v195_v14  ;;  %v555_v18 = vpop.f32.mrb[3].mxu0 }
 0x138   :  { %573 = vmatmul.mubr.bf16.vlgmr.msra.gmra.mrb[0].mxu1 %v291_v17 }
 0x20b   :  { %v340_v35 = vpop.f32.mrb[0].mxu1 }
 0x20c   :  { %v341_v36 = vadd.f32 %v340_v35, %v304_v34  ;;  %v574_v37 = vpop.f32.mrb[1].mxu1 }
 0x20d   :  { %v343_v38 = vpop.f32.mrb[2].mxu1 }
 0x20e   :  { %v437_v39 = vpack.c.bf16 %v341_v36, %v341_v36  ;;  %v575_v40 = vpop.f32.mrb[3].mxu1 }
 0x210   :  { %593 = vmatmul.mubr.bf16.vlgmr.msra.gmra.mrb[4].mxu0 %v437_v39 }
 0x2e3   :  { %v486_v47 = vpop.f32.mrb[4].mxu0 }
 0x2e4   :  { %v487_v48 = vadd.f32 %v486_v47, %v450_v46  ;;  %v594_v49 = vpop.f32.mrb[5].mxu0 }
 0x2e5   :  { %v489_v50 = vpop.f32.mrb[6].mxu0 }
 0x2e6   :  { %492 = vst [vmem:[#allocation8] sm:$0xff] %v487_v48  ;;  %v595_v51 = vpop.f32.mrb[7].mxu0 }
 0x2e7   :  { %683 = shalt.err (!%p680_p0)
}
 0x2e8   :  { %s684_s28 = scalar_lea.hbm %s811_s3, 128 }
 0x2e9   :  { %p685_p1 = scmp.ne.s32.totalorder %s811_s3, %s684_s28  ;;  %p688_p2 = scmp.lt.u32.totalorder %s684_s28, %s811_s3 }
 0x2eb   :  { %p690_p3 = pnand %p688_p2, %p685_p1 }
 0x2ed   :  { %693 = shalt.err (!%p690_p3)
}
 0x2ee   :  { %502 = dma.vmem_to_hbm [thread:$0]  %s500_s24, 128, %s811_s3, [#allocation4]  }
 0x2ef   :  { %698 = dma.done.wait [#allocation4], 128  }
 0x2f0   :  { %699 = vsyncadd [#allocation4], 4294967168 }
 0x2f1   :  { %506 = vsyncpa [#allocation3], 1 }
 0x2f2   :  { %507 = vsyncpa [#allocation6], 1 }
 0x2f3   :  { %508 = vsyncpa [#allocation4], 1 }

</bundles_post_ra>
